<compile_context>
chip_gen: v6e
topology: v6e:2x2x1
jax: 0.10.0
libtpu: 0.0.40
codegen_flags: <defaults>
</compile_context>

<pallas_src>
import jax
import jax.numpy as jnp
from jax.experimental import pallas as pl
from jax.experimental.pallas import tpu as pltpu

HIDDEN = 128
ACT_DIM = 2  # Linear(130, 128) => 130 - 128 = 2 action features


def _round_up(x, m):
    return (x + m - 1) // m * m


def critic_kernel(obs_ref, act_ref,
                  w1_ref, b1_ref,
                  w2x_ref, w2a_ref, b2_ref,
                  w3_ref, b3_ref,
                  w4_ref, b4_ref,
                  out_ref):
    f32 = jnp.float32
    bf16 = jnp.bfloat16

    # layer1: Linear(state_size, 128) + ReLU. obs cast to bf16 here (cheap VPU
    # pack hidden under the MXU; avoids a separate wrapper cast pass over HBM).
    obs = obs_ref[...].astype(bf16)
    h1 = jnp.dot(obs, w1_ref[...], preferred_element_type=f32) + b1_ref[...]
    x1 = jnp.maximum(h1, 0.0)

    # layer2: cat([x1, action]) @ W2 + b2
    #   == x1 @ W2x (MXU) + action-part as two VPU broadcast FMAs (K=2).
    h2 = jnp.dot(x1.astype(bf16), w2x_ref[...], preferred_element_type=f32)
    act = act_ref[...].astype(f32)          # (TB, 2)
    w2a = w2a_ref[...]                      # (2, 128) f32 end-to-end (never on MXU)
    h2 = (h2
          + act[:, 0:1] * w2a[0:1, :]
          + act[:, 1:2] * w2a[1:2, :]
          + b2_ref[...])
    x2 = jnp.maximum(h2, 0.0)

    # layer3: Linear(128, 128) + ReLU
    h3 = jnp.dot(x2.astype(bf16), w3_ref[...], preferred_element_type=f32) + b3_ref[...]
    x3 = jnp.maximum(h3, 0.0)

    # layer4: Linear(128, action_size)
    q = jnp.dot(x3.astype(bf16), w4_ref[...], preferred_element_type=f32) + b4_ref[...]
    out_ref[...] = q.astype(out_ref.dtype)
    # TODO(synk): if profiling shows the 4-lane-wide output store is exposed at
    # very large B, emit q transposed (action_size, B) for lane-dense vst.


def prepare_params(params):
    """One-time dtype prep (call once, reuse across forward calls).

    bf16 for the MXU-feeding weights, f32 for biases and the tiny action
    weight (pure VPU path). Hoisted out of the per-call path so an RL loop
    doesn't re-pay ~9 cast launches every forward."""
    return dict(
        w1=params["w1"].astype(jnp.bfloat16),
        w2x=params["w2x"].astype(jnp.bfloat16),
        w2a=params["w2a"].astype(jnp.float32),
        w3=params["w3"].astype(jnp.bfloat16),
        w4=params["w4"].astype(jnp.bfloat16),
        b1=params["b1"].astype(jnp.float32),
        b2=params["b2"].astype(jnp.float32),
        b3=params["b3"].astype(jnp.float32),
        b4=params["b4"].astype(jnp.float32),
    )


def vector_obs_critic_forward(obs, action, params, *, block_b=1024):
    """Fused critic MLP with a batch grid and VMEM-resident weights.

    `params` should be the output of prepare_params() (dtypes already set),
    but raw f32 params also work (they'll just be consumed as-is/cast by XLA).
    """
    B, S = obs.shape
    action_size = params["w4"].shape[1]

    # Batch tile: multiple of 8 (f32 sublanes). Cap so the grid has >= 2 steps
    # whenever B allows it -- a single-step "parallel" grid leaves one of the
    # two v7x TensorCores idle.
    TB = min(_round_up(block_b, 8), max(8, _round_up(pl.cdiv(B, 2), 8)))
    grid = (pl.cdiv(B, TB),)  # partial last block handled by Pallas (no pad/slice)

    batch_map = lambda i: (i, 0)   # tiled along batch
    const_map = lambda i: (0, 0)   # weights/biases stay VMEM-resident

    in_specs = [
        pl.BlockSpec((TB, S), batch_map),                 # obs (f32, cast in-kernel)
        pl.BlockSpec((TB, ACT_DIM), batch_map),           # action
        pl.BlockSpec((S, HIDDEN), const_map),             # w1 (bf16)
        pl.BlockSpec((1, HIDDEN), const_map),             # b1
        pl.BlockSpec((HIDDEN, HIDDEN), const_map),        # w2x (bf16)
        pl.BlockSpec((ACT_DIM, HIDDEN), const_map),       # w2a (f32)
        pl.BlockSpec((1, HIDDEN), const_map),             # b2
        pl.BlockSpec((HIDDEN, HIDDEN), const_map),        # w3 (bf16)
        pl.BlockSpec((1, HIDDEN), const_map),             # b3
        pl.BlockSpec((HIDDEN, action_size), const_map),   # w4 (bf16)
        pl.BlockSpec((1, action_size), const_map),        # b4
    ]
    out_spec = pl.BlockSpec((TB, action_size), batch_map)

    # Advisory cost hint for the XLA scheduler.
    flops = 2 * B * (S * HIDDEN + HIDDEN * HIDDEN + ACT_DIM * HIDDEN
                     + HIDDEN * HIDDEN + HIDDEN * action_size)
    bytes_accessed = (obs.size * 4 + action.size * 4 + B * action_size * 4
                      + (params["w1"].size + params["w2x"].size
                         + params["w3"].size + params["w4"].size) * 2
                      + params["w2a"].size * 4
                      + sum(params[b].size * 4 for b in ("b1", "b2", "b3", "b4")))

    act_in = action if action.dtype == jnp.float32 else action.astype(jnp.float32)

    return pl.pallas_call(
        critic_kernel,
        out_shape=jax.ShapeDtypeStruct((B, action_size), jnp.float32),
        grid=grid,
        in_specs=in_specs,
        out_specs=out_spec,
        compiler_params=pltpu.CompilerParams(
            dimension_semantics=("parallel",),
            # Headroom for large batch tiles on v5e (16 MiB scoped default);
            # well within physical VMEM on every generation (incl. v7x 64 MiB).
            vmem_limit_bytes=32 << 20,
        ),
        cost_estimate=pl.CostEstimate(flops=flops, transcendentals=0,
                                      bytes_accessed=bytes_accessed),
    )(obs, act_in,
      params["w1"], params["b1"],
      params["w2x"], params["w2a"], params["b2"],
      params["w3"], params["b3"],
      params["w4"], params["b4"])


def init_params(key, state_size, action_size, hidden=HIDDEN, act_dim=ACT_DIM):
    """Deterministic synthetic parameters (PyTorch Linear init, stored [in, out], f32)."""
    ks = jax.random.split(key, 8)

    def lin(kw, kb, fan_in, fan_out):
        bound = 1.0 / jnp.sqrt(fan_in)
        w = jax.random.uniform(kw, (fan_in, fan_out), jnp.float32, -bound, bound)
        b = jax.random.uniform(kb, (1, fan_out), jnp.float32, -bound, bound)
        return w, b

    w1, b1 = lin(ks[0], ks[1], state_size, hidden)
    # layer2 is Linear(130, 128); split its weight into x-part and action-part.
    w2_full, b2 = lin(ks[2], ks[3], hidden + act_dim, hidden)
    w2x, w2a = w2_full[:hidden], w2_full[hidden:]
    w3, b3 = lin(ks[4], ks[5], hidden, hidden)
    w4, b4 = lin(ks[6], ks[7], hidden, action_size)

    return dict(w1=w1, b1=b1, w2x=w2x, w2a=w2a, b2=b2,
                w3=w3, b3=b3, w4=w4, b4=b4)


def reference_forward(obs, action, p):
    """Pure-JAX reference matching the PyTorch forward semantics, with the same
    bf16 quantization of the MXU dot operands (f32 accumulation) as the kernel;
    the action weight path stays f32 exactly like the kernel."""
    bf16, f32 = jnp.bfloat16, jnp.float32
    x = jnp.maximum(
        jnp.dot(obs.astype(bf16), p["w1"].astype(bf16),
                preferred_element_type=f32) + p["b1"], 0.0)
    # cat([x, action]) @ W2 + b2  ==  x @ W2x + action @ W2a + b2
    h2 = (jnp.dot(x.astype(bf16), p["w2x"].astype(bf16), preferred_element_type=f32)
          + action.astype(f32) @ p["w2a"].astype(f32)
          + p["b2"])
    x = jnp.maximum(h2, 0.0)
    x = jnp.maximum(
        jnp.dot(x.astype(bf16), p["w3"].astype(bf16),
                preferred_element_type=f32) + p["b3"], 0.0)
    return jnp.dot(x.astype(bf16), p["w4"].astype(bf16),
                   preferred_element_type=f32) + p["b4"]


if __name__ == "__main__":
    # Small shapes consistent with the module: state_size=16, action feature
    # dim=2 (implied by Linear(130,128)), action_size=4. Batch 40 with a tile
    # of 16 exercises the multi-step batch grid (3 steps) including a partial
    # final block (40 = 16 + 16 + 8) without any wrapper-side padding.
    B, STATE_SIZE, ACTION_SIZE = 40, 16, 4

    key = jax.random.PRNGKey(0)
    k_obs, k_act, k_params = jax.random.split(key, 3)

    obs = jax.random.normal(k_obs, (B, STATE_SIZE), jnp.float32)
    action = jax.random.normal(k_act, (B, ACT_DIM), jnp.float32)

    raw_params = init_params(k_params, STATE_SIZE, ACTION_SIZE)
    params = prepare_params(raw_params)   # one-time dtype prep, reused across calls

    q_val = vector_obs_critic_forward(obs, action, params, block_b=16)
    q_val = jax.block_until_ready(q_val)

    q_ref = reference_forward(obs, action, raw_params)
    assert q_val.shape == (B, ACTION_SIZE)
    assert jnp.allclose(q_val, q_ref, atol=1e-2, rtol=1e-2), (
        float(jnp.max(jnp.abs(q_val - q_ref))))

    print("KERNEL_OK")
</pallas_src>

<mosaic_0001>
module attributes {stable_mosaic.version = 11 : i64} {
  func.func @critic_kernel(%arg0: i32, %arg1: memref<16x16xf32, #tpu.memory_space<vmem>>, %arg2: memref<16x2xf32, #tpu.memory_space<vmem>>, %arg3: memref<16x128xbf16, #tpu.memory_space<vmem>>, %arg4: memref<1x128xf32, #tpu.memory_space<vmem>>, %arg5: memref<128x128xbf16, #tpu.memory_space<vmem>>, %arg6: memref<2x128xf32, #tpu.memory_space<vmem>>, %arg7: memref<1x128xf32, #tpu.memory_space<vmem>>, %arg8: memref<128x128xbf16, #tpu.memory_space<vmem>>, %arg9: memref<1x128xf32, #tpu.memory_space<vmem>>, %arg10: memref<128x4xbf16, #tpu.memory_space<vmem>>, %arg11: memref<1x4xf32, #tpu.memory_space<vmem>>, %arg12: memref<16x4xf32, #tpu.memory_space<vmem>>) attributes {dimension_semantics = [#tpu.dimension_semantics<parallel>], iteration_bounds = array<i64: 3>, scalar_prefetch = 0 : i64, scratch_operands = 0 : i64, tpu.core_type = #tpu.core_type<tc>, window_params = [{transform_indices = @transform_0, window_bounds = array<i64: 16, 16>}, {transform_indices = @transform_1, window_bounds = array<i64: 16, 2>}, {pipeline_mode = #tpu.pipeline_mode<synchronous>, transform_indices = @transform_2, window_bounds = array<i64: 16, 128>}, {pipeline_mode = #tpu.pipeline_mode<synchronous>, transform_indices = @transform_3, window_bounds = array<i64: 1, 128>}, {pipeline_mode = #tpu.pipeline_mode<synchronous>, transform_indices = @transform_4, window_bounds = array<i64: 128, 128>}, {pipeline_mode = #tpu.pipeline_mode<synchronous>, transform_indices = @transform_5, window_bounds = array<i64: 2, 128>}, {pipeline_mode = #tpu.pipeline_mode<synchronous>, transform_indices = @transform_6, window_bounds = array<i64: 1, 128>}, {pipeline_mode = #tpu.pipeline_mode<synchronous>, transform_indices = @transform_7, window_bounds = array<i64: 128, 128>}, {pipeline_mode = #tpu.pipeline_mode<synchronous>, transform_indices = @transform_8, window_bounds = array<i64: 1, 128>}, {pipeline_mode = #tpu.pipeline_mode<synchronous>, transform_indices = @transform_9, window_bounds = array<i64: 128, 4>}, {pipeline_mode = #tpu.pipeline_mode<synchronous>, transform_indices = @transform_10, window_bounds = array<i64: 1, 4>}, {transform_indices = @transform_11, window_bounds = array<i64: 16, 4>}]} {
    %c0 = arith.constant 0 : index
    %c0_0 = arith.constant 0 : index
    %0 = vector.load %arg1[%c0, %c0_0] : memref<16x16xf32, #tpu.memory_space<vmem>>, vector<16x16xf32>
    %1 = arith.truncf %0 : vector<16x16xf32> to vector<16x16xbf16>
    %c0_1 = arith.constant 0 : index
    %c0_2 = arith.constant 0 : index
    %2 = vector.load %arg3[%c0_1, %c0_2] : memref<16x128xbf16, #tpu.memory_space<vmem>>, vector<16x128xbf16>
    %cst = arith.constant dense<0.000000e+00> : vector<16x128xf32>
    %3 = tpu.matmul %1, %2, %cst {dimension_numbers = #tpu.dot_dimension_numbers<[1], [0], [0], [1], [0, 0, 1, 1], [], []>} : vector<16x16xbf16>, vector<16x128xbf16>, vector<16x128xf32> -> vector<16x128xf32>
    %c0_3 = arith.constant 0 : index
    %c0_4 = arith.constant 0 : index
    %4 = vector.load %arg4[%c0_3, %c0_4] : memref<1x128xf32, #tpu.memory_space<vmem>>, vector<1x128xf32>
    %5 = vector.broadcast %4 : vector<1x128xf32> to vector<16x128xf32>
    %6 = arith.addf %3, %5 : vector<16x128xf32>
    %cst_5 = arith.constant 0.000000e+00 : f32
    %7 = vector.broadcast %cst_5 : f32 to vector<16x128xf32>
    %8 = arith.maximumf %6, %7 : vector<16x128xf32>
    %9 = arith.truncf %8 : vector<16x128xf32> to vector<16x128xbf16>
    %c0_6 = arith.constant 0 : index
    %c0_7 = arith.constant 0 : index
    %10 = vector.load %arg5[%c0_6, %c0_7] : memref<128x128xbf16, #tpu.memory_space<vmem>>, vector<128x128xbf16>
    %cst_8 = arith.constant dense<0.000000e+00> : vector<16x128xf32>
    %11 = tpu.matmul %9, %10, %cst_8 {dimension_numbers = #tpu.dot_dimension_numbers<[1], [0], [0], [1], [0, 0, 1, 1], [], []>} : vector<16x128xbf16>, vector<128x128xbf16>, vector<16x128xf32> -> vector<16x128xf32>
    %c0_9 = arith.constant 0 : index
    %c0_10 = arith.constant 0 : index
    %12 = vector.load %arg2[%c0_9, %c0_10] : memref<16x2xf32, #tpu.memory_space<vmem>>, vector<16x2xf32>
    %c0_11 = arith.constant 0 : index
    %c0_12 = arith.constant 0 : index
    %13 = vector.load %arg6[%c0_11, %c0_12] : memref<2x128xf32, #tpu.memory_space<vmem>>, vector<2x128xf32>
    %14 = vector.extract_strided_slice %12 {offsets = [0, 0], sizes = [16, 1], strides = [1, 1]} : vector<16x2xf32> to vector<16x1xf32>
    %15 = vector.extract_strided_slice %13 {offsets = [0, 0], sizes = [1, 128], strides = [1, 1]} : vector<2x128xf32> to vector<1x128xf32>
    %16 = vector.broadcast %14 : vector<16x1xf32> to vector<16x128xf32>
    %17 = vector.broadcast %15 : vector<1x128xf32> to vector<16x128xf32>
    %18 = arith.mulf %16, %17 : vector<16x128xf32>
    %19 = arith.addf %11, %18 : vector<16x128xf32>
    %20 = vector.extract_strided_slice %12 {offsets = [0, 1], sizes = [16, 1], strides = [1, 1]} : vector<16x2xf32> to vector<16x1xf32>
    %21 = vector.extract_strided_slice %13 {offsets = [1, 0], sizes = [1, 128], strides = [1, 1]} : vector<2x128xf32> to vector<1x128xf32>
    %22 = vector.broadcast %20 : vector<16x1xf32> to vector<16x128xf32>
    %23 = vector.broadcast %21 : vector<1x128xf32> to vector<16x128xf32>
    %24 = arith.mulf %22, %23 : vector<16x128xf32>
    %25 = arith.addf %19, %24 : vector<16x128xf32>
    %c0_13 = arith.constant 0 : index
    %c0_14 = arith.constant 0 : index
    %26 = vector.load %arg7[%c0_13, %c0_14] : memref<1x128xf32, #tpu.memory_space<vmem>>, vector<1x128xf32>
    %27 = vector.broadcast %26 : vector<1x128xf32> to vector<16x128xf32>
    %28 = arith.addf %25, %27 : vector<16x128xf32>
    %cst_15 = arith.constant 0.000000e+00 : f32
    %29 = vector.broadcast %cst_15 : f32 to vector<16x128xf32>
    %30 = arith.maximumf %28, %29 : vector<16x128xf32>
    %31 = arith.truncf %30 : vector<16x128xf32> to vector<16x128xbf16>
    %c0_16 = arith.constant 0 : index
    %c0_17 = arith.constant 0 : index
    %32 = vector.load %arg8[%c0_16, %c0_17] : memref<128x128xbf16, #tpu.memory_space<vmem>>, vector<128x128xbf16>
    %cst_18 = arith.constant dense<0.000000e+00> : vector<16x128xf32>
    %33 = tpu.matmul %31, %32, %cst_18 {dimension_numbers = #tpu.dot_dimension_numbers<[1], [0], [0], [1], [0, 0, 1, 1], [], []>} : vector<16x128xbf16>, vector<128x128xbf16>, vector<16x128xf32> -> vector<16x128xf32>
    %c0_19 = arith.constant 0 : index
    %c0_20 = arith.constant 0 : index
    %34 = vector.load %arg9[%c0_19, %c0_20] : memref<1x128xf32, #tpu.memory_space<vmem>>, vector<1x128xf32>
    %35 = vector.broadcast %34 : vector<1x128xf32> to vector<16x128xf32>
    %36 = arith.addf %33, %35 : vector<16x128xf32>
    %cst_21 = arith.constant 0.000000e+00 : f32
    %37 = vector.broadcast %cst_21 : f32 to vector<16x128xf32>
    %38 = arith.maximumf %36, %37 : vector<16x128xf32>
    %39 = arith.truncf %38 : vector<16x128xf32> to vector<16x128xbf16>
    %c0_22 = arith.constant 0 : index
    %c0_23 = arith.constant 0 : index
    %40 = vector.load %arg10[%c0_22, %c0_23] : memref<128x4xbf16, #tpu.memory_space<vmem>>, vector<128x4xbf16>
    %cst_24 = arith.constant dense<0.000000e+00> : vector<16x4xf32>
    %41 = tpu.matmul %39, %40, %cst_24 {dimension_numbers = #tpu.dot_dimension_numbers<[1], [0], [0], [1], [0, 0, 1, 1], [], []>} : vector<16x128xbf16>, vector<128x4xbf16>, vector<16x4xf32> -> vector<16x4xf32>
    %c0_25 = arith.constant 0 : index
    %c0_26 = arith.constant 0 : index
    %42 = vector.load %arg11[%c0_25, %c0_26] : memref<1x4xf32, #tpu.memory_space<vmem>>, vector<1x4xf32>
    %43 = vector.broadcast %42 : vector<1x4xf32> to vector<16x4xf32>
    %44 = arith.addf %41, %43 : vector<16x4xf32>
    %c0_27 = arith.constant 0 : index
    %c0_28 = arith.constant 0 : index
    %45 = vector.load %arg12[%c0_27, %c0_28] : memref<16x4xf32, #tpu.memory_space<vmem>>, vector<16x4xf32>
    tpu.vector_store %arg12[%c0_27, %c0_28], %44 {strides = array<i32>} : memref<16x4xf32, #tpu.memory_space<vmem>>, vector<16x4xf32>,
    return
  }
  func.func @transform_0(%arg0: i32) -> (i32, i32) {
    %c0_i32 = arith.constant 0 : i32
    %c0_i32_0 = arith.constant 0 : i32
    return %arg0, %c0_i32 : i32, i32
  }
  func.func @transform_1(%arg0: i32) -> (i32, i32) {
    %c0_i32 = arith.constant 0 : i32
    %c0_i32_0 = arith.constant 0 : i32
    return %arg0, %c0_i32 : i32, i32
  }
  func.func @transform_2(%arg0: i32) -> (i32, i32) {
    %c0_i32 = arith.constant 0 : i32
    %c0_i32_0 = arith.constant 0 : i32
    %c0_i32_1 = arith.constant 0 : i32
    return %c0_i32, %c0_i32_0 : i32, i32
  }
  func.func @transform_3(%arg0: i32) -> (i32, i32) {
    %c0_i32 = arith.constant 0 : i32
    %c0_i32_0 = arith.constant 0 : i32
    %c0_i32_1 = arith.constant 0 : i32
    return %c0_i32, %c0_i32_0 : i32, i32
  }
  func.func @transform_4(%arg0: i32) -> (i32, i32) {
    %c0_i32 = arith.constant 0 : i32
    %c0_i32_0 = arith.constant 0 : i32
    %c0_i32_1 = arith.constant 0 : i32
    return %c0_i32, %c0_i32_0 : i32, i32
  }
  func.func @transform_5(%arg0: i32) -> (i32, i32) {
    %c0_i32 = arith.constant 0 : i32
    %c0_i32_0 = arith.constant 0 : i32
    %c0_i32_1 = arith.constant 0 : i32
    return %c0_i32, %c0_i32_0 : i32, i32
  }
  func.func @transform_6(%arg0: i32) -> (i32, i32) {
    %c0_i32 = arith.constant 0 : i32
    %c0_i32_0 = arith.constant 0 : i32
    %c0_i32_1 = arith.constant 0 : i32
    return %c0_i32, %c0_i32_0 : i32, i32
  }
  func.func @transform_7(%arg0: i32) -> (i32, i32) {
    %c0_i32 = arith.constant 0 : i32
    %c0_i32_0 = arith.constant 0 : i32
    %c0_i32_1 = arith.constant 0 : i32
    return %c0_i32, %c0_i32_0 : i32, i32
  }
  func.func @transform_8(%arg0: i32) -> (i32, i32) {
    %c0_i32 = arith.constant 0 : i32
    %c0_i32_0 = arith.constant 0 : i32
    %c0_i32_1 = arith.constant 0 : i32
    return %c0_i32, %c0_i32_0 : i32, i32
  }
  func.func @transform_9(%arg0: i32) -> (i32, i32) {
    %c0_i32 = arith.constant 0 : i32
    %c0_i32_0 = arith.constant 0 : i32
    %c0_i32_1 = arith.constant 0 : i32
    return %c0_i32, %c0_i32_0 : i32, i32
  }
  func.func @transform_10(%arg0: i32) -> (i32, i32) {
    %c0_i32 = arith.constant 0 : i32
    %c0_i32_0 = arith.constant 0 : i32
    %c0_i32_1 = arith.constant 0 : i32
    return %c0_i32, %c0_i32_0 : i32, i32
  }
  func.func @transform_11(%arg0: i32) -> (i32, i32) {
    %c0_i32 = arith.constant 0 : i32
    %c0_i32_0 = arith.constant 0 : i32
    return %arg0, %c0_i32 : i32, i32
  }
}

</mosaic_0001>

<bundles_post_ra>
// kernel: tpu_custom_call.1
= control target key start
LH: loop header
LB: loop body
LE: loop exit
PB: predicated region body
PF: predicated region fallthrough
CT: control target
= control target key end

     0   :  { %s1557_s17 = smov 0   ;;  %s1559_s18 = smov 0   ;;  %s1769_s0 = inlined_call_operand.vmem [shape: f32[40,16], index: 0, kind: input, shape index: {}]   ;;  %s1770_s1 = inlined_call_operand.vmem [shape: f32[40,2], index: 1, kind: input, shape index: {}]   ;;  %s1771_s2 = inlined_call_operand.vmem [shape: bf16[16,128], index: 2, kind: input, shape index: {}]   ;;  %s1772_s3 = inlined_call_operand.vmem [shape: f32[1,128], index: 3, kind: input, shape index: {}]   ;;  %s1773_s4 = inlined_call_operand.vmem [shape: bf16[128,128], index: 4, kind: input, shape index: {}]   ;;  %s1774_s5 = inlined_call_operand.vmem [shape: f32[2,128], index: 5, kind: input, shape index: {}]   ;;  %s1775_s6 = inlined_call_operand.vmem [shape: f32[1,128], index: 6, kind: input, shape index: {}]   ;;  %s1776_s7 = inlined_call_operand.vmem [shape: bf16[128,128], index: 7, kind: input, shape index: {}]   ;;  %s1777_s8 = inlined_call_operand.vmem [shape: f32[1,128], index: 8, kind: input, shape index: {}]   ;;  %s1778_s9 = inlined_call_operand.vmem [shape: bf16[128,4], index: 9, kind: input, shape index: {}]   ;;  %s1779_s10 = inlined_call_operand.vmem [shape: f32[1,4], index: 10, kind: input, shape index: {}]   ;;  %s1780_s11 = inlined_call_operand.vmem [shape: f32[40,4], index: 11, kind: output, shape index: {}]  }
   0x1   :  { %s1561_s19 = smov 0  }
   0x2 LB: > { %s1570_s20 = sadd.s32 4294967295, %s1459_s19   ;;  %s1572_s21 = sadd.s32 1, %s1459_s19   ;;  %s1459_s19 = sphi %s1561_s19, %s1784_s19   ;;  %s1455_s18 = sphi %s1559_s18, %s1783_s18   ;;  %s1451_s17 = sphi %s1557_s17, %s1782_s17  }
   0x3   : > { %s266_s22 = ssub.s32 %s1459_s19, %s1572_s21  ;;  %s269_s23 = sadd.s32 1, %s1455_s18 }
   0x4   : > { %p267_p0 = scmp.eq.s32.totalorder %s266_s22, 0  ;;  %p279_p1 = scmp.ne.s32.totalorder %s1455_s18, %s1451_s17 }
   0x5   : > { %p280_p2 = scmp.eq.s32.totalorder %s1570_s20, 2  ;;  %p1134_p3 = scmp.ge.s32.totalorder %s1459_s19, 1 }
   0x6   : > { %s1580_s24 = scalar_select %p267_p0, %s1455_s18, %s269_s23  }
   0x7   : > { %p1582_p4 = por %p280_p2, %p279_p1  ;;  %p365_p5 = scmp.lt.s32.totalorder %s1459_s19, 4 }
   0x9   : > { %p366_p6 = pnand %p1134_p3, %p365_p5 }
   0xa   : > { %s1591_s28 = sshll.u32 (!%p366_p6), %s1570_s20, 1 }
   0xb   : > { %369 = sbr.rel (%p366_p6) target bundleno = 875 (0x36b), region = 64  ;;  %p422_p7 = scmp.lt.s32.totalorder (!%p366_p6), %s1591_s28, 4 }
  0x10   : > { %v1380_v0 = vld [vmem:[%s1771_s2] sm:$0xff]   ;;  %v1493_v1 = vmov 0.0   ;;  %v1381_v2 = vld [vmem:[%s1773_s4 + $0x38] sm:$0xff]   ;;  %vm1494_vm0 = vmmov 0   ;;  %v1382_v3 = vld [vmem:[%s1773_s4 + $0x30] sm:$0xff]   ;;  %s1606_s14 = scalar_select %p422_p7, %s1591_s28, 4  ;;  %v546_v40 = vlaneseq }
  0x11   : > { %1219 = vmatprep.subr.bf16.mxu0 %v1493_v1  ;;  %1225 = vmatprep.subr.bf16.mxu1 %v1493_v1  ;;  %v1383_v4 = vld [vmem:[%s1773_s4 + $0x28] sm:$0xff]   ;;  %vm469_vm1 = vcmask 130048   ;;  %v1384_v8 = vld [vmem:[%s1773_s4 + $0x20] sm:$0xff]   ;;  %v1385_v9 = vld [vmem:[%s1773_s4 + $0x18] sm:$0xff]   ;;  %v1495_v14 = vmov 0   ;;  %v1496_v16 = vmov 1  }
  0x12   : > { %1220 = vmatpush3.bf16.msra.mxu0 %v1380_v0  ;;  %1221 = vmatprep.mubr.msk.bf16.mxu0 %vm1494_vm0, %v1493_v1  ;;  %s1137_s15 = sshll.u32 %s1606_s14, 3  ;;  %v1386_v10 = vld [vmem:[%s1773_s4 + $0x10] sm:$0xff]   ;;  %v1387_v11 = vld [vmem:[%s1773_s4 + $0x8] sm:$0xff]   ;;  %v1388_v12 = vld [vmem:[%s1773_s4] sm:$0xff]   ;;  %v547_v41 = vshrl.u32 %v546_v40, 7  ;;  %vm896_vm2 = vcmask 31744  }
  0x13   : > { %1226 = vmatpush3.bf16.msra.mxu1 %v1381_v2  ;;  %1241 = vmatprep.mubr.msk.bf16.mxu1 %vm1494_vm0, %v1493_v1  ;;  %s425_s26 = scalar_lea.vmem %s1769_s0, %s1137_s15  ;;  %s439_s29 = scalar_lea.vmem %s1770_s1, %s1137_s15  ;;  %v1389_v13 = vld [vmem:[%s1776_s7 + $0x38] sm:$0xff]   ;;  %v1390_v18 = vld [vmem:[%s1776_s7 + $0x30] sm:$0xff]   ;;  %v1391_v19 = vld [vmem:[%s1776_s7 + $0x28] sm:$0xff]  }
  0x14   : > { %1227 = vmatprep.subr.bf16.mxu1 %v1493_v1  ;;  %1245 = vmatprep.subr.bf16.mxu0 %v1493_v1  ;;  %v451_v5 = vld [vmem:[%s425_s26] sm:$0xff]  ;;  %v452_v6 = vld [vmem:[%s425_s26 + $0x8] sm:$0xff]  ;;  %v1393_v31 = vld [vmem:[%s1776_s7 + $0x18] sm:$0xff]   ;;  %v548_v42 = vsub.s32 0, %v547_v41  ;;  %v651_v44 = vsub.s32 1, %v547_v41  ;;  %s414_s15 = sand.u32 1, %s1451_s17  }
  0x15   : > { %v453_v7 = vpack.c.bf16 %v452_v6, %v451_v5  ;;  %1377 = vset.pattern.permute.xlu0 %v1495_v14  ;;  %v533_v15 = vld [vmem:[%s439_s29] sm:$0xff]  ;;  %1378 = vset.pattern.permute.xlu1 %v1496_v16  ;;  %v534_v17 = vld [vmem:[%s439_s29 + $0x8] sm:$0xff]  ;;  %v1394_v32 = vld [vmem:[%s1776_s7 + $0x10] sm:$0xff]   ;;  %s1135_s16 = sshll.u32 %s414_s15, 4  ;;  %s907_s17 = ssub.s32 (%p1582_p4), 5, %s1591_s28 }
  0x16   : > { %538 = vperm.xlu0 %1377, %v533_v15   ;;  %642 = vperm.xlu1 %1378, %v533_v15   ;;  %v1392_v20 = vld [vmem:[%s1776_s7 + $0x20] sm:$0xff]   ;;  %v1395_v33 = vld [vmem:[%s1776_s7 + $0x8] sm:$0xff]   ;;  %v1397_v35 = vld [vmem:[%s1778_s9 + $0x38] sm:$0xff]   ;;  %s1724_s23 = scalar_lea.vmem [#allocation2], %s1135_s16   ;;  %s1187_s26 = sshll.u32 (%p1582_p4), %s1570_s20, 4 }
  0x17   : > { %1228 = vmatpush3.bf16.msra.mxu1 %v1382_v3  ;;  %1222 = vmatmul.mubr.msk.bf16.vlgmr.msra.gmra.mxu0 %vm469_vm1, %v453_v7  ;;  %v1140_v21 = vld [vmem:[%s1772_s3] ss:$0 sm:$0xff]  ;;  %v1398_v36 = vld [vmem:[%s1778_s9 + $0x30] sm:$0xff]   ;;  %v1399_v37 = vld [vmem:[%s1778_s9 + $0x28] sm:$0xff]   ;;  %p908_p8 = scmp.lt.s32.totalorder (%p1582_p4), %s907_s17, 2  ;;  %s1735_s30 = scalar_lea.vmem (%p1582_p4), %s1780_s11, %s1187_s26  }
  0x18   : > { %1229 = vmatprep.subr.bf16.mxu1 %v1493_v1  ;;  %1261 = vmatprep.mubr.msk.bf16.mxu0 %vm1494_vm0, %v1493_v1  ;;  %v1396_v34 = vld [vmem:[%s1776_s7] sm:$0xff]   ;;  %v1401_v39 = vld [vmem:[%s1778_s9 + $0x18] sm:$0xff]   ;;  %v1402_v6 = vld [vmem:[%s1778_s9 + $0x10] sm:$0xff]  }
  0x19   : > { %1246 = vmatpush3.bf16.msra.mxu0 %v1389_v13  ;;  %v1400_v38 = vld [vmem:[%s1778_s9 + $0x20] sm:$0xff]   ;;  %v1403_v7 = vld [vmem:[%s1778_s9 + $0x8] sm:$0xff]  }
  0x1a   : > { %1247 = vmatprep.subr.bf16.mxu0 %v1493_v1  ;;  %543 = vperm.xlu0 %1377, %v534_v17   ;;  %v535_v43 = vld [vmem:[%s1774_s5] sm:$0x3] }
  0x1b   : > { %1230 = vmatpush3.bf16.msra.mxu1 %v1383_v4  ;;  %646 = vperm.xlu1 %1378, %v534_v17   ;;  %v549_v45 = vrot.slane %v535_v43, %v548_v42  ;;  %v652_v47 = vrot.slane %v535_v43, %v651_v44  ;;  %v1151_v58 = vld [vmem:[%s1775_s6] ss:$0 sm:$0xff] }
  0x1c   : > { %1231 = vmatprep.subr.bf16.mxu1 %v1493_v1 }
  0x1d   : > { %1248 = vmatpush3.bf16.msra.mxu0 %v1390_v18 }
  0x1e   : > { %1249 = vmatprep.subr.bf16.mxu0 %v1493_v1  ;;  %1379 = vset.pattern.permute.xlu0 %v1496_v16 }
  0x1f   : > { %1232 = vmatpush3.bf16.msra.mxu1 %v1384_v8  ;;  %v1404_v8 = vld [vmem:[%s1778_s9] sm:$0xff]  }
  0x20   : > { %1233 = vmatprep.subr.bf16.mxu1 %v1493_v1 }
  0x21   : > { %1250 = vmatpush3.bf16.msra.mxu0 %v1391_v19 }
  0x22   : > { %1251 = vmatprep.subr.bf16.mxu0 %v1493_v1 }
  0x23   : > { %1234 = vmatpush3.bf16.msra.mxu1 %v1385_v9  ;;  %v1152_v9 = vld [vmem:[%s1777_s8] ss:$0 sm:$0xff] }
  0x24   : > { %1235 = vmatprep.subr.bf16.mxu1 %v1493_v1 }
  0x25   : > { %1252 = vmatpush3.bf16.msra.mxu0 %v1392_v20 }
  0x26   : > { %1253 = vmatprep.subr.bf16.mxu0 %v1493_v1 }
  0x27   : > { %1236 = vmatpush3.bf16.msra.mxu1 %v1386_v10 }
  0x28   : > { %1237 = vmatprep.subr.bf16.mxu1 %v1493_v1 }
  0x29   : > { %1254 = vmatpush3.bf16.msra.mxu0 %v1393_v31 }
  0x2a   : > { %1255 = vmatprep.subr.bf16.mxu0 %v1493_v1 }
  0x2b   : > { %1238 = vmatpush3.bf16.msra.mxu1 %v1387_v11 }
  0x2c   : > { %1239 = vmatprep.subr.bf16.mxu1 %v1493_v1 }
  0x2d   : > { %1256 = vmatpush3.bf16.msra.mxu0 %v1394_v32 }
  0x2e   : > { %1257 = vmatprep.subr.bf16.mxu0 %v1493_v1 }
  0x2f   : > { %1240 = vmatpush3.bf16.msra.mxu1 %v1388_v12 }
  0x30   : > { %1265 = vmatprep.subr.bf16.mxu1 %v1493_v1 }
  0x31   : > { %1258 = vmatpush3.bf16.msra.mxu0 %v1395_v33 }
  0x32   : > { %1259 = vmatprep.subr.bf16.mxu0 %v1493_v1 }
  0x35   : > { %1260 = vmatpush3.bf16.msra.mxu0 %v1396_v34 }
  0x91   : > { %v539_v46 = vpop.permute.xlu0 %538  ;;  %v643_v48 = vpop.permute.xlu1 %642 }
  0x92   : > { %v550_v49 = vmul.f32 %v549_v45, %v539_v46  ;;  %v653_v50 = vmul.f32 %v652_v47, %v643_v48 }
  0x95   : > { %v544_v51 = vpop.permute.xlu0 %543 }
  0x96   : > { %v647_v54 = vpop.permute.xlu1 %646  ;;  %v551_v56 = vmul.f32 %v549_v45, %v544_v51 }
  0x97   : > { %v654_v60 = vmul.f32 %v652_v47, %v647_v54 }
  0xd7   : > { %v507_v22 = vpop.f32.mrf.mxu0 }
  0xd8   : > { %v508_v24 = vadd.f32 %v1140_v21, %v507_v22 }
  0xd9   : > { %v1223_v23 = vpop.f32.mrf.mxu0 }
  0xda   : > { %v514_v28 = vmax.f32 %v508_v24, 0.0 }
  0xdb   : > { %v510_v25 = vpop.f32.mrf.mxu0 }
  0xdc   : > { %v511_v26 = vadd.f32 %v1140_v21, %v510_v25 }
  0xdd   : > { %v1224_v27 = vpop.f32.mrf.mxu0 }
  0xde   : > { %v515_v29 = vmax.f32 %v511_v26, 0.0 }
  0xe0   : > { %v516_v30 = vpack.c.bf16 %v515_v29, %v514_v28 }
  0xe2   : > { %1242 = vmatmul.mubr.bf16.vlgmr.msra.gmra.mxu1 %v516_v30 }
  0xe3   : > { %1281 = vmatprep.mubr.msk.bf16.mxu1 %vm1494_vm0, %v1493_v1  ;;  %1266 = vmatpush3.bf16.msra.mxu1 %v1397_v35 }
  0xe4   : > { %1267 = vmatprep.subr.bf16.mxu1 %v1493_v1 }
  0xe7   : > { %1268 = vmatpush3.bf16.msra.mxu1 %v1398_v36 }
  0xe8   : > { %1269 = vmatprep.subr.bf16.mxu1 %v1493_v1 }
  0xeb   : > { %1270 = vmatpush3.bf16.msra.mxu1 %v1399_v37 }
  0xec   : > { %1271 = vmatprep.subr.bf16.mxu1 %v1493_v1 }
  0xef   : > { %1272 = vmatpush3.bf16.msra.mxu1 %v1400_v38 }
  0xf0   : > { %1273 = vmatprep.subr.bf16.mxu1 %v1493_v1 }
  0xf3   : > { %1274 = vmatpush3.bf16.msra.mxu1 %v1401_v39 }
  0xf4   : > { %1275 = vmatprep.subr.bf16.mxu1 %v1493_v1 }
  0xf7   : > { %1276 = vmatpush3.bf16.msra.mxu1 %v1402_v6 }
  0xf8   : > { %1277 = vmatprep.subr.bf16.mxu1 %v1493_v1 }
  0xfb   : > { %1278 = vmatpush3.bf16.msra.mxu1 %v1403_v7 }
  0xfc   : > { %1279 = vmatprep.subr.bf16.mxu1 %v1493_v1  ;;  %v1161_v1 = vld [vmem:[%s1779_s10] ss:$0 sm:$0xff] }
  0xff   : > { %1280 = vmatpush3.bf16.msra.mxu1 %v1404_v8 }
 0x1a2   : > { %v634_v52 = vpop.f32.mrf.mxu1 }
 0x1a3   : > { %v635_v53 = vadd.f32 %v634_v52, %v550_v49 }
 0x1a4   : > { %v1243_v55 = vpop.f32.mrf.mxu1 }
 0x1a5   : > { %v655_v57 = vadd.f32 %v653_v50, %v635_v53 }
 0x1a6   : > { %v637_v59 = vpop.f32.mrf.mxu1 }
 0x1a7   : > { %v638_v61 = vadd.f32 %v637_v59, %v551_v56  ;;  %v664_v63 = vadd.f32 %v1151_v58, %v655_v57 }
 0x1a8   : > { %v1244_v62 = vpop.f32.mrf.mxu1 }
 0x1a9   : > { %v656_v0 = vadd.f32 %v654_v60, %v638_v61  ;;  %v666_v3 = vmax.f32 %v664_v63, 0.0 }
 0x1ab   : > { %v665_v2 = vadd.f32 %v1151_v58, %v656_v0 }
 0x1ad   : > { %v667_v4 = vmax.f32 %v665_v2, 0.0 }
 0x1af   : > { %v668_v5 = vpack.c.bf16 %v667_v4, %v666_v3 }
 0x1b1   : > { %1262 = vmatmul.mubr.bf16.vlgmr.msra.gmra.mxu0 %v668_v5 }
 0x271   : > { %v774_v10 = vpop.f32.mrf.mxu0 }
 0x272   : > { %v775_v12 = vadd.f32 %v1152_v9, %v774_v10 }
 0x273   : > { %v1263_v11 = vpop.f32.mrf.mxu0 }
 0x274   : > { %v781_v16 = vmax.f32 %v775_v12, 0.0 }
 0x275   : > { %v777_v13 = vpop.f32.mrf.mxu0 }
 0x276   : > { %v778_v14 = vadd.f32 %v1152_v9, %v777_v13 }
 0x277   : > { %v1264_v15 = vpop.f32.mrf.mxu0 }
 0x278   : > { %v782_v17 = vmax.f32 %v778_v14, 0.0 }
 0x27a   : > { %v783_v18 = vpack.c.bf16 %v782_v17, %v781_v16 }
 0x27c   : > { %1282 = vmatmul.mubr.bf16.vlgmr.msra.gmra.mxu1 %v783_v18 }
 0x33c   : > { %v889_v19 = vpop.f32.mrf.mxu1 }
 0x33d   : > { %v890_v20 = vadd.f32 %v1161_v1, %v889_v19 }
 0x33e   : > { %v1283_v21 = vpop.f32.mrf.mxu1 }
 0x33f   : > { %897 = vst.msk [vmem:[%s1724_s23] sm:$0xff] %vm896_vm2, %v890_v20  ;;  %905 = sbr.rel (!%p1582_p4) target bundleno = 875 (0x36b), region = 68 }
 0x340   : > { %v892_v22 = vpop.f32.mrf.mxu1 }
 0x341   : > { %v893_v23 = vadd.f32 %v1161_v1, %v892_v22 }
 0x342   : > { %v1284_v24 = vpop.f32.mrf.mxu1 }
 0x343   : > { %898 = vst.msk [vmem:[%s1724_s23 + $0x8] sm:$0xff] %vm896_vm2, %v893_v23 }
 0x344   : > { %s1786_s17 = smov (!%p908_p8, %s907_s17), 2 }
 0x345   : > { %s1172_s12 = sshll.u32 %s1786_s17, 7 }
 0x346   : > { %p1175_p9 = scmp.eq.s32.totalorder %s1172_s12, 0 }
 0x347   : > { %s1741_s13 = sshrl.u32 (!%p1175_p9), %s1786_s17, 1 }
 0x348   : > { %916 = sbr.rel (%p1175_p9) target bundleno = 875 (0x36b), region = 72  ;;  %p1176_p10 = scmp.le.s32.totalorder (!%p1175_p9), %s1741_s13, 0 }
 0x34d   : > { %1081 = sbr.rel (%p1176_p10) target bundleno = 858 (0x35a), region = 151  ;;  %s1461_s20 = smov (!%p1176_p10), %s1735_s30  }
 0x34e   : > { %s1465_s25 = smov (!%p1176_p10), %s1724_s23   ;;  %s1469_s28 = smov (!%p1176_p10), 0  }
 0x34f   : > { %s1473_s14 = smov (!%p1176_p10), 0  }
 0x352 LB: >> { %v981_v25 = vld [vmem:[%s1467_s25] sm:$0xff]  ;;  %v983_v26 = vld [vmem:[%s1467_s25 + $0x8] sm:$0xff]  ;;  %s985_s15 = sadd.s32 1, %s1471_s28  ;;  %s975_s14 = sadd.s32 1, %s1475_s14   ;;  %s1475_s14 = sphi %s1473_s14, %s975_s14   ;;  %s1471_s28 = sphi %s1469_s28, %s1470_s28   ;;  %s1467_s25 = sphi %s1465_s25, %s990_s25   ;;  %s1463_s20 = sphi %s1461_s20, %s991_s20  }
 0x353   : >> { %982 = vst [vmem:[%s1463_s20] sm:$0xff] %v981_v25  ;;  %984 = vst [vmem:[%s1463_s20 + $0x8] sm:$0xff] %v983_v26  ;;  %p986_p11 = scmp.ge.s32.totalorder %s985_s15, %s1741_s13  ;;  %p974_p12 = scmp.ge.s32.totalorder %s975_s14, %s1741_s13 }
 0x355   : >> { %s1788_s15 = smov (%p986_p11, %s985_s15), 0  ;;  %977 = sbr.rel (!%p974_p12) target bundleno = 850 (0x352), region = 157 }
 0x356   : >> { %s1177_s16 = sshll.u32 %s1788_s15, 4  ;;  %s1470_s28 = smov %s1788_s15  }
 0x357   : >> { %s990_s25 = scalar_lea.vmem %s1724_s23, %s1177_s16 [#allocation2]   ;;  %s991_s20 = scalar_lea.vmem %s1735_s30, %s1177_s16  }
 0x35a PF: > { %s1751_s19 = sand.u32 1, %s1786_s17   ;;  %s1188_s22 = sshll.u32 %s1741_s13, 4 }
 0x35b   : > { %s996_s26 = scalar_lea.vmem %s1724_s23, %s1188_s22 [#allocation2]   ;;  %s998_s27 = scalar_lea.vmem %s1735_s30, %s1188_s22  }
 0x35c   : > { %p1182_p13 = scmp.le.s32.totalorder %s1751_s19, 0 }
 0x35d   : > { %s1477_s29 = smov (!%p1182_p13), %s998_s27   ;;  %s1481_s12 = smov (!%p1182_p13), %s996_s26  }
 0x35e   : > { %1095 = sbr.rel (%p1182_p13) target bundleno = 875 (0x36b), region = 162  ;;  %s1485_s20 = smov (!%p1182_p13), 0  }
 0x35f   : > { %s1489_s25 = smov (!%p1182_p13), 0  }
 0x363 LB: >> { %v1008_v27 = vld [vmem:[%s1483_s12] sm:$0xff]  ;;  %s1010_s17 = sadd.s32 1, %s1487_s20  ;;  %s1002_s25 = sadd.s32 1, %s1491_s25   ;;  %s1491_s25 = sphi %s1489_s25, %s1002_s25   ;;  %s1487_s20 = sphi %s1485_s20, %s1486_s20   ;;  %s1483_s12 = sphi %s1481_s12, %s1015_s12   ;;  %s1479_s29 = sphi %s1477_s29, %s1016_s29  }
 0x364   : >> { %1009 = vst [vmem:[%s1479_s29] sm:$0xff] %v1008_v27  ;;  %p1011_p0 = scmp.ge.s32.totalorder %s1010_s17, %s1751_s19  ;;  %p1001_p1 = scmp.ge.s32.totalorder %s1002_s25, %s1751_s19 }
 0x366   : >> { %s1790_s17 = smov (%p1011_p0, %s1010_s17), 0  ;;  %1004 = sbr.rel (!%p1001_p1) target bundleno = 867 (0x363), region = 168 }
 0x367   : >> { %s1183_s23 = sshll.u32 %s1790_s17, 3  ;;  %s1486_s20 = smov %s1790_s17  }
 0x368   : >> { %s1015_s12 = scalar_lea.vmem %s996_s26, %s1183_s23 [#allocation2]   ;;  %s1016_s29 = scalar_lea.vmem %s998_s27, %s1183_s23  }
 0x36b PF: > { %p18_p2 = scmp.ge.s32.totalorder %s1572_s21, 5   ;;  %s1782_s17 = smov %s1455_s18 }
 0x36c   : > { %s1783_s18 = smov %s1580_s24  ;;  %s1784_s19 = smov %s1572_s21 }
 0x36d   :  { %20 = sbr.rel (!%p18_p2) target bundleno = 2 (0x2), region = 179 }

</bundles_post_ra>
